<compile_context>
chip_gen: v7x
topology: tpu7x:2x2x1
jax: 0.10.0
libtpu: 0.0.40
codegen_flags: <defaults>
</compile_context>

<pallas_src>
import numpy as np
import jax
import jax.numpy as jnp
from jax.experimental import pallas as pl
from jax.experimental.pallas import tpu as pltpu

# --- ConnectFour geometry implied by the module: 12*d = 144 flat features ---
D = 12                       # d
K1, K2 = 4, 2                # conv kernel sizes
C_IN, H, W = 1, 6, 7         # ConnectFour board as a 1-channel image
H1, W1 = H - K1 + 1, W - K1 + 1      # 3, 4  (after conv1)
H2, W2 = H1 - K2 + 1, W1 - K2 + 1    # 2, 3  (after conv2)
F0 = C_IN * H * W                    # 42
F1 = D * H1 * W1                     # 144
F2 = (2 * D) * H2 * W2               # 144 == 12 * d


def _cdiv(a, b):
    return -(-a // b)


def _round_up(a, b):
    return _cdiv(a, b) * b


def conv_to_dense(w, ci, h, w_, co, kh, kw):
    """Dense M of shape (ci*h*w_, co*oh*ow) s.t. flat(x) @ M == flat(conv_valid(x, w))."""
    oh, ow = h - kh + 1, w_ - kw + 1
    m = np.zeros((ci * h * w_, co * oh * ow), dtype=np.float32)
    wn = np.asarray(w, dtype=np.float32)
    for c_o in range(co):
        for i_o in range(oh):
            for j_o in range(ow):
                out_idx = c_o * oh * ow + i_o * ow + j_o
                for c_i in range(ci):
                    for a in range(kh):
                        for b in range(kw):
                            in_idx = c_i * h * w_ + (i_o + a) * w_ + (j_o + b)
                            m[in_idx, out_idx] = wn[c_o, c_i, a, b]
    return m


def _choose_tile(n, *, tm_max=2048, tm_min=512, min_steps=8):
    """Padding-aware batch tile.

    1. grid length g = max(steps needed at tm_max, min_steps) — but never force
       tiles smaller than ~tm_min (so tiny/medium batches don't pay 8x the
       ~0.35 us per-step overhead just for megacore).
    2. tm = round_up(cdiv(n, g), 16)  (multiple of 16 so the in-kernel row-half
       MXU split stays 8-row aligned).
    """
    n = max(int(n), 1)
    g = _cdiv(n, tm_max)
    g = max(g, min(min_steps, _cdiv(n, tm_min)))
    tm = _round_up(_cdiv(n, g), 16)
    n_pad = _round_up(n, tm)
    return tm, n_pad


# ----------------------------- Pallas kernel --------------------------------
def value_mlp_kernel(x_ref, w1_ref, b1_ref, w2_ref, b2_ref, w3_ref, b3_ref, o_ref):
    tm = x_ref.shape[0]

    def run_rows(rows):
        # Layer 1 (conv1 as dense matmul): bf16 MXU operands, f32 accumulation.
        x = x_ref[rows, :].astype(jnp.bfloat16)
        h1 = jnp.dot(x, w1_ref[...], preferred_element_type=jnp.float32)
        h1 = jnp.maximum(h1 + b1_ref[...], 0.0)                 # f32 bias + ReLU (VPU)
        # Layer 2 (conv2 as dense matmul).
        h2 = jnp.dot(h1.astype(jnp.bfloat16), w2_ref[...],
                     preferred_element_type=jnp.float32)
        h2 = jnp.maximum(h2 + b2_ref[...], 0.0)
        # fc_1 (144 -> 1): broadcast-multiply (VPU) + lane reduction (XLU),
        # avoiding an N=1 MXU push. All f32.
        v = jnp.sum(h2 * w3_ref[...], axis=-1, keepdims=True) + b3_ref[...]
        o_ref[rows, :] = jnp.tanh(v)                            # EUP

    if tm >= 256 and tm % 16 == 0:
        # Two independent row-half chains so both MXUs (v6e/v7x: 2x256^2 per TC)
        # receive row blocks on this single-N-tile problem.
        half = tm // 2
        run_rows(pl.ds(0, half))
        run_rows(pl.ds(half, half))
    else:
        run_rows(pl.ds(0, tm))


def value_network_forward(obs, params, *, tm=None):
    """obs: (*batch_shape, 1, 6, 7) -> value: (*batch_shape, 1)."""
    batch_shape = obs.shape[:-3]
    x = obs.reshape(-1, F0).astype(jnp.float32)
    n = x.shape[0]

    if tm is None:
        tm, n_pad = _choose_tile(n)
    else:
        tm = _round_up(min(max(int(tm), 16), _round_up(max(n, 1), 16)), 16)
        n_pad = _round_up(n, tm)

    if n_pad != n:
        x = jnp.pad(x, ((0, n_pad - n), (0, 0)))
    grid = (n_pad // tm,)

    weight_bytes = sum(int(np.prod(p.shape)) * p.dtype.itemsize for p in params.values())
    cost = pl.CostEstimate(
        flops=2 * n_pad * (F0 * F1 + F1 * F2 + F2),
        transcendentals=n_pad,
        bytes_accessed=n_pad * (F0 * 4 + 4) + weight_bytes,
    )

    out = pl.pallas_call(
        value_mlp_kernel,
        out_shape=jax.ShapeDtypeStruct((n_pad, 1), jnp.float32),
        grid_spec=pltpu.PrefetchScalarGridSpec(
            num_scalar_prefetch=0,
            grid=grid,
            in_specs=[
                pl.BlockSpec((tm, F0), lambda i: (i, 0)),   # x: streamed batch tile
                pl.BlockSpec((F0, F1), lambda i: (0, 0)),   # w1: resident (bf16)
                pl.BlockSpec((1, F1), lambda i: (0, 0)),    # b1: resident (f32)
                pl.BlockSpec((F1, F2), lambda i: (0, 0)),   # w2: resident (bf16)
                pl.BlockSpec((1, F2), lambda i: (0, 0)),    # b2: resident (f32)
                pl.BlockSpec((1, F2), lambda i: (0, 0)),    # w3 row: resident (f32)
                pl.BlockSpec((1, 1), lambda i: (0, 0)),     # b3: resident (f32)
            ],
            out_specs=pl.BlockSpec((tm, 1), lambda i: (i, 0)),
        ),
        compiler_params=pltpu.CompilerParams(
            dimension_semantics=("parallel",),
            # Explicit: lifts v5e's 16 MiB default scoped limit for tm up to 2048
            # (usage ~10-16 MiB); equals the default on v6e/v7x, well under
            # physical VMEM on every generation.
            vmem_limit_bytes=32 * 1024 * 1024,
        ),
        cost_estimate=cost,
    )(x, params["w1"], params["b1"], params["w2"], params["b2"],
      params["w3"], params["b3"])

    return out[:n].reshape(*batch_shape, 1)


# -------------------------- deterministic params -----------------------------
def init_params(key):
    ks = jax.random.split(key, 6)

    def u(k, shape, fan_in):  # PyTorch-style U(-1/sqrt(fan_in), 1/sqrt(fan_in))
        b = 1.0 / np.sqrt(fan_in)
        return jax.random.uniform(k, shape, jnp.float32, -b, b)

    conv1_w = u(ks[0], (D, C_IN, K1, K1), C_IN * K1 * K1)
    conv1_b = u(ks[1], (D,), C_IN * K1 * K1)
    conv2_w = u(ks[2], (2 * D, D, K2, K2), D * K2 * K2)
    conv2_b = u(ks[3], (2 * D,), D * K2 * K2)
    fc_w = u(ks[4], (1, F2), F2)
    fc_b = u(ks[5], (1,), F2)

    dense = dict(
        # bf16 MXU operands (halves weight DMA/VMEM); f32 accumulation in-kernel.
        w1=jnp.asarray(conv_to_dense(conv1_w, C_IN, H, W, D, K1, K1)).astype(jnp.bfloat16),
        b1=jnp.repeat(conv1_b, H1 * W1).reshape(1, F1),
        w2=jnp.asarray(conv_to_dense(conv2_w, D, H1, W1, 2 * D, K2, K2)).astype(jnp.bfloat16),
        b2=jnp.repeat(conv2_b, H2 * W2).reshape(1, F2),
        w3=fc_w.reshape(1, F2),     # f32 row, consumed on VPU/XLU
        b3=fc_b.reshape(1, 1),
    )
    raw = dict(conv1_w=conv1_w, conv1_b=conv1_b, conv2_w=conv2_w,
               conv2_b=conv2_b, fc_w=fc_w, fc_b=fc_b)
    return dense, raw


# ----------------------- pure-JAX reference (for check) ----------------------
def reference_forward(obs, raw):
    # Mirrors the kernel's bf16-operand / f32-accumulate numerics.
    batch_shape = obs.shape[:-3]
    x = obs.reshape((-1,) + obs.shape[-3:]).astype(jnp.float32)
    y = jax.lax.conv_general_dilated(
        x.astype(jnp.bfloat16), raw["conv1_w"].astype(jnp.bfloat16), (1, 1), "VALID",
        dimension_numbers=("NCHW", "OIHW", "NCHW"),
        preferred_element_type=jnp.float32)
    y = jnp.maximum(y + raw["conv1_b"][None, :, None, None], 0.0)
    y = jax.lax.conv_general_dilated(
        y.astype(jnp.bfloat16), raw["conv2_w"].astype(jnp.bfloat16), (1, 1), "VALID",
        dimension_numbers=("NCHW", "OIHW", "NCHW"),
        preferred_element_type=jnp.float32)
    y = jnp.maximum(y + raw["conv2_b"][None, :, None, None], 0.0)
    e = y.reshape(*batch_shape, -1)
    return jnp.tanh(e @ raw["fc_w"].T + raw["fc_b"])


if __name__ == "__main__":
    key = jax.random.PRNGKey(0)
    pkey, xkey, xkey2 = jax.random.split(key, 3)
    params, raw = init_params(pkey)

    # Small check: batch_shape = (2, 4), single small tile, no row-half split.
    obs = jax.random.uniform(xkey, (2, 4, C_IN, H, W), jnp.float32)
    value = jax.block_until_ready(value_network_forward(obs, params))
    assert value.shape == (2, 4, 1), value.shape
    ref = reference_forward(obs, raw)
    np.testing.assert_allclose(np.asarray(value), np.asarray(ref), rtol=5e-4, atol=5e-4)

    # Larger check: exercises the adaptive tile chooser (multiple grid steps,
    # small padding remainder) and the in-kernel row-half MXU split.
    obs_big = jax.random.uniform(xkey2, (5, 300, C_IN, H, W), jnp.float32)
    value_big = jax.block_until_ready(value_network_forward(obs_big, params))
    assert value_big.shape == (5, 300, 1), value_big.shape
    ref_big = reference_forward(obs_big, raw)
    np.testing.assert_allclose(np.asarray(value_big), np.asarray(ref_big), rtol=5e-4, atol=5e-4)

    # Explicit-tm override path (exercises the fixed-tile code branch too).
    value_fixed = jax.block_until_ready(value_network_forward(obs_big, params, tm=256))
    np.testing.assert_allclose(np.asarray(value_fixed), np.asarray(ref_big), rtol=5e-4, atol=5e-4)

    print("KERNEL_OK")
</pallas_src>

<mosaic_0001>
module attributes {stable_mosaic.version = 11 : i64} {
  func.func @value_mlp_kernel(%arg0: i32, %arg1: memref<16x42xf32, #tpu.memory_space<vmem>>, %arg2: memref<42x144xbf16, #tpu.memory_space<vmem>>, %arg3: memref<1x144xf32, #tpu.memory_space<vmem>>, %arg4: memref<144x144xbf16, #tpu.memory_space<vmem>>, %arg5: memref<1x144xf32, #tpu.memory_space<vmem>>, %arg6: memref<1x144xf32, #tpu.memory_space<vmem>>, %arg7: memref<1x1xf32, #tpu.memory_space<vmem>>, %arg8: memref<16x1xf32, #tpu.memory_space<vmem>>) attributes {dimension_semantics = [#tpu.dimension_semantics<parallel>], iteration_bounds = array<i64: 1>, scalar_prefetch = 0 : i64, scratch_operands = 0 : i64, tpu.core_type = #tpu.core_type<tc>, window_params = [{transform_indices = @transform_0, window_bounds = array<i64: 16, 42>}, {pipeline_mode = #tpu.pipeline_mode<synchronous>, transform_indices = @transform_1, window_bounds = array<i64: 42, 144>}, {pipeline_mode = #tpu.pipeline_mode<synchronous>, transform_indices = @transform_2, window_bounds = array<i64: 1, 144>}, {pipeline_mode = #tpu.pipeline_mode<synchronous>, transform_indices = @transform_3, window_bounds = array<i64: 144, 144>}, {pipeline_mode = #tpu.pipeline_mode<synchronous>, transform_indices = @transform_4, window_bounds = array<i64: 1, 144>}, {pipeline_mode = #tpu.pipeline_mode<synchronous>, transform_indices = @transform_5, window_bounds = array<i64: 1, 144>}, {pipeline_mode = #tpu.pipeline_mode<synchronous>, transform_indices = @transform_6, window_bounds = array<i64: 1, 1>}, {transform_indices = @transform_7, window_bounds = array<i64: 16, 1>}]} {
    %c0 = arith.constant 0 : index
    %c0_0 = arith.constant 0 : index
    %0 = vector.load %arg1[%c0, %c0_0] : memref<16x42xf32, #tpu.memory_space<vmem>>, vector<16x42xf32>
    %1 = arith.truncf %0 : vector<16x42xf32> to vector<16x42xbf16>
    %c0_1 = arith.constant 0 : index
    %c0_2 = arith.constant 0 : index
    %2 = vector.load %arg2[%c0_1, %c0_2] : memref<42x144xbf16, #tpu.memory_space<vmem>>, vector<42x144xbf16>
    %cst = arith.constant dense<0.000000e+00> : vector<16x144xf32>
    %3 = tpu.matmul %1, %2, %cst {dimension_numbers = #tpu.dot_dimension_numbers<[1], [0], [0], [1], [0, 0, 1, 1], [], []>} : vector<16x42xbf16>, vector<42x144xbf16>, vector<16x144xf32> -> vector<16x144xf32>
    %c0_3 = arith.constant 0 : index
    %c0_4 = arith.constant 0 : index
    %4 = vector.load %arg3[%c0_3, %c0_4] : memref<1x144xf32, #tpu.memory_space<vmem>>, vector<1x144xf32>
    %5 = vector.broadcast %4 : vector<1x144xf32> to vector<16x144xf32>
    %6 = arith.addf %3, %5 : vector<16x144xf32>
    %cst_5 = arith.constant 0.000000e+00 : f32
    %7 = vector.broadcast %cst_5 : f32 to vector<16x144xf32>
    %8 = arith.maximumf %6, %7 : vector<16x144xf32>
    %9 = arith.truncf %8 : vector<16x144xf32> to vector<16x144xbf16>
    %c0_6 = arith.constant 0 : index
    %c0_7 = arith.constant 0 : index
    %10 = vector.load %arg4[%c0_6, %c0_7] : memref<144x144xbf16, #tpu.memory_space<vmem>>, vector<144x144xbf16>
    %cst_8 = arith.constant dense<0.000000e+00> : vector<16x144xf32>
    %11 = tpu.matmul %9, %10, %cst_8 {dimension_numbers = #tpu.dot_dimension_numbers<[1], [0], [0], [1], [0, 0, 1, 1], [], []>} : vector<16x144xbf16>, vector<144x144xbf16>, vector<16x144xf32> -> vector<16x144xf32>
    %c0_9 = arith.constant 0 : index
    %c0_10 = arith.constant 0 : index
    %12 = vector.load %arg5[%c0_9, %c0_10] : memref<1x144xf32, #tpu.memory_space<vmem>>, vector<1x144xf32>
    %13 = vector.broadcast %12 : vector<1x144xf32> to vector<16x144xf32>
    %14 = arith.addf %11, %13 : vector<16x144xf32>
    %cst_11 = arith.constant 0.000000e+00 : f32
    %15 = vector.broadcast %cst_11 : f32 to vector<16x144xf32>
    %16 = arith.maximumf %14, %15 : vector<16x144xf32>
    %c0_12 = arith.constant 0 : index
    %c0_13 = arith.constant 0 : index
    %17 = vector.load %arg6[%c0_12, %c0_13] : memref<1x144xf32, #tpu.memory_space<vmem>>, vector<1x144xf32>
    %18 = vector.broadcast %17 : vector<1x144xf32> to vector<16x144xf32>
    %19 = arith.mulf %16, %18 : vector<16x144xf32>
    %cst_14 = arith.constant dense<0.000000e+00> : vector<16xf32>
    %20 = vector.multi_reduction <add>, %19, %cst_14 [1] : vector<16x144xf32> to vector<16xf32>
    %21 = vector.shape_cast %20 : vector<16xf32> to vector<16x1xf32>
    %c0_15 = arith.constant 0 : index
    %c0_16 = arith.constant 0 : index
    %22 = vector.load %arg7[%c0_15, %c0_16] : memref<1x1xf32, #tpu.memory_space<vmem>>, vector<1x1xf32>
    %23 = vector.broadcast %22 : vector<1x1xf32> to vector<16x1xf32>
    %24 = arith.addf %21, %23 : vector<16x1xf32>
    %25 = math.tanh %24 : vector<16x1xf32>
    %c0_17 = arith.constant 0 : index
    %c0_18 = arith.constant 0 : index
    %26 = vector.load %arg8[%c0_17, %c0_18] : memref<16x1xf32, #tpu.memory_space<vmem>>, vector<16x1xf32>
    tpu.vector_store %arg8[%c0_17, %c0_18], %25 {strides = array<i32>} : memref<16x1xf32, #tpu.memory_space<vmem>>, vector<16x1xf32>,
    return
  }
  func.func @transform_0(%arg0: i32) -> (i32, i32) {
    %c0_i32 = arith.constant 0 : i32
    %c0_i32_0 = arith.constant 0 : i32
    return %arg0, %c0_i32 : i32, i32
  }
  func.func @transform_1(%arg0: i32) -> (i32, i32) {
    %c0_i32 = arith.constant 0 : i32
    %c0_i32_0 = arith.constant 0 : i32
    %c0_i32_1 = arith.constant 0 : i32
    return %c0_i32, %c0_i32_0 : i32, i32
  }
  func.func @transform_2(%arg0: i32) -> (i32, i32) {
    %c0_i32 = arith.constant 0 : i32
    %c0_i32_0 = arith.constant 0 : i32
    %c0_i32_1 = arith.constant 0 : i32
    return %c0_i32, %c0_i32_0 : i32, i32
  }
  func.func @transform_3(%arg0: i32) -> (i32, i32) {
    %c0_i32 = arith.constant 0 : i32
    %c0_i32_0 = arith.constant 0 : i32
    %c0_i32_1 = arith.constant 0 : i32
    return %c0_i32, %c0_i32_0 : i32, i32
  }
  func.func @transform_4(%arg0: i32) -> (i32, i32) {
    %c0_i32 = arith.constant 0 : i32
    %c0_i32_0 = arith.constant 0 : i32
    %c0_i32_1 = arith.constant 0 : i32
    return %c0_i32, %c0_i32_0 : i32, i32
  }
  func.func @transform_5(%arg0: i32) -> (i32, i32) {
    %c0_i32 = arith.constant 0 : i32
    %c0_i32_0 = arith.constant 0 : i32
    %c0_i32_1 = arith.constant 0 : i32
    return %c0_i32, %c0_i32_0 : i32, i32
  }
  func.func @transform_6(%arg0: i32) -> (i32, i32) {
    %c0_i32 = arith.constant 0 : i32
    %c0_i32_0 = arith.constant 0 : i32
    %c0_i32_1 = arith.constant 0 : i32
    return %c0_i32, %c0_i32_0 : i32, i32
  }
  func.func @transform_7(%arg0: i32) -> (i32, i32) {
    %c0_i32 = arith.constant 0 : i32
    %c0_i32_0 = arith.constant 0 : i32
    return %arg0, %c0_i32 : i32, i32
  }
}

</mosaic_0001>

<bundles_post_ra>
// kernel: tpu_custom_call.1
= control target key start
LH: loop header
LB: loop body
LE: loop exit
PB: predicated region body
PF: predicated region fallthrough
CT: control target
= control target key end

     0   :  { %s657_s0 = inlined_call_operand.hbm [shape: f32[16,42], index: 0, kind: input, shape index: {}]   ;;  %s658_s1 = inlined_call_operand.hbm [shape: bf16[42,144], index: 1, kind: input, shape index: {}]   ;;  %s659_s2 = inlined_call_operand.vmem [shape: f32[1,144], index: 2, kind: input, shape index: {}]   ;;  %s660_s3 = inlined_call_operand.hbm [shape: bf16[144,144], index: 3, kind: input, shape index: {}]   ;;  %s661_s4 = inlined_call_operand.vmem [shape: f32[1,144], index: 4, kind: input, shape index: {}]   ;;  %s662_s5 = inlined_call_operand.vmem [shape: f32[1,144], index: 5, kind: input, shape index: {}]   ;;  %s663_s6 = inlined_call_operand.<no memory space> [shape: f32[1,1], index: 6, kind: input, shape index: {}]   ;;  %s664_s7 = inlined_call_operand.vmem [shape: f32[16,1], index: 7, kind: output, shape index: {}]  }
   0x1   :  { %v12_v0 = vstv %s663_s6 }
   0x2   :  { %13 = vst [vmem:[#allocation2] sm:$0x1] %v12_v0 }
   0x3   :  { %14 = vsyncpa [#allocation4], 0 }
   0x4   :  { %15 = vsyncpa [#allocation6], 0  ;;  %s538_s26 = smov [#allocation5]   ;;  %s539_s28 = smov [#allocation3]  }
   0x5   :  { %s33_s27 = sshll.u32 %s538_s26, 4  ;;  %s21_s29 = sshll.u32 %s539_s28, 4  ;;  %s34_s27 = int_to_ptr.vmem [resolvable:$true] %s33_s27  ;;  %s587_s29 = int_to_ptr.vmem [resolvable:$true] %s21_s29 }
   0x6   :  { %s468_s9 = scalar_lea.hbm %s658_s1, 768 }
   0x7   :  { %p469_p0 = scmp.ne.s32.totalorder %s658_s1, %s468_s9  ;;  %p472_p1 = scmp.lt.u32.totalorder %s468_s9, %s658_s1 }
   0x9   :  { %p474_p2 = pnand %p472_p1, %p469_p0 }
   0xb   :  { %477 = shalt.err (!%p474_p2)
}
   0xc   :  { %s478_s13 = scalar_lea.vmem %s34_s27, 768  ;;  %p483_p4 = scmp.lt.s32.totalorder %s34_s27, %s34_s27 }
   0xd   :  { %p479_p3 = scmp.ne.s32.totalorder %s34_s27, %s478_s13  ;;  %p484_p5 = scmp.lt.s32.totalorder %s478_s13, %s478_s13 }
   0xf   :  { %p485_p6 = por %p484_p5, %p483_p4 }
  0x11   :  { %p486_p7 = pnand %p485_p6, %p479_p3 }
  0x13   :  { %489 = shalt.err (!%p486_p7)
}
  0x14   :  { %s540_s14 = smov 128   ;;  %s541_s15 = smov 8  }
  0x15   :  { %39 = dma.hbm_to_vmem [thread:$0]  %s658_s1, 768, %s34_s27, [#allocation6], %s540_s14, %s540_s14, %s541_s15  }
  0x16   :  { %s490_s20 = scalar_lea.hbm %s657_s0, 256 }
  0x17   :  { %p491_p8 = scmp.ne.s32.totalorder %s657_s0, %s490_s20  ;;  %p494_p9 = scmp.lt.u32.totalorder %s490_s20, %s657_s0 }
  0x19   :  { %p496_p10 = pnand %p494_p9, %p491_p8 }
  0x1b   :  { %499 = shalt.err (!%p496_p10)
}
  0x1c   :  { %s500_s25 = scalar_lea.vmem %s587_s29, 256  ;;  %p505_p12 = scmp.lt.s32.totalorder %s587_s29, %s587_s29 }
  0x1d   :  { %p501_p11 = scmp.ne.s32.totalorder %s587_s29, %s500_s25  ;;  %p506_p13 = scmp.lt.s32.totalorder %s500_s25, %s500_s25 }
  0x1f   :  { %p507_p0 = por %p506_p13, %p505_p12 }
  0x21   :  { %p508_p1 = pnand %p507_p0, %p501_p11 }
  0x23   :  { %511 = shalt.err (!%p508_p1)
}
  0x24   :  { %27 = dma.hbm_to_vmem [thread:$0]  %s657_s0, 256, %s587_s29, [#allocation4], %s540_s14, %s540_s14, %s541_s15  }
  0x25   :  { %s542_s27 = smov [#allocation7]   ;;  %s512_s9 = scalar_lea.hbm %s660_s3, 2304 }
  0x26   :  { %s47_s28 = sshll.u32 %s542_s27, 4  ;;  %p513_p2 = scmp.ne.s32.totalorder %s660_s3, %s512_s9  ;;  %s48_s28 = int_to_ptr.vmem [resolvable:$true] %s47_s28 }
  0x27   :  { %p516_p3 = scmp.lt.u32.totalorder %s512_s9, %s660_s3 }
  0x29   :  { %p518_p4 = pnand %p516_p3, %p513_p2 }
  0x2b   :  { %521 = shalt.err (!%p518_p4)
}
  0x2c   :  { %s522_s13 = scalar_lea.vmem %s48_s28, 2304  ;;  %p527_p6 = scmp.lt.s32.totalorder %s48_s28, %s48_s28 }
  0x2d   :  { %p523_p5 = scmp.ne.s32.totalorder %s48_s28, %s522_s13  ;;  %p528_p7 = scmp.lt.s32.totalorder %s522_s13, %s522_s13 }
  0x2f   :  { %p529_p8 = por %p528_p7, %p527_p6 }
  0x31   :  { %p530_p9 = pnand %p529_p8, %p523_p5 }
  0x33   :  { %533 = shalt.err (!%p530_p9)
}
  0x34   :  { %53 = dma.hbm_to_vmem [thread:$0]  %s660_s3, 2304, %s48_s28, [#allocation6], %s540_s14, %s540_s14, %s541_s15  }
  0x35   :  { %534 = dma.done.wait [#allocation4], 256  }
  0x36   :  { %535 = vsyncadd [#allocation4], 4294967040 }
  0x37   :  { %536 = dma.done.wait [#allocation6], 3072  }
  0x38   :  { %537 = vsyncadd [#allocation6], 4294964224  ;;  %v543_v1 = vmov 0   ;;  %v428_v2 = vld [vmem:[#allocation5 + $0x4] ss:$8 sps:$4 sm:$0xff]   ;;  %vm123_vm0 = vcmask 1044480   ;;  %v81_v30 = vlaneseq }
  0x39   :  { %162 = vmatprep.mubr.bf16.mxu0 %v543_v1  ;;  %v430_v3 = vld [vmem:[#allocation5] ss:$8 sps:$4 sm:$0xff]   ;;  %130 = vmatprep.subr.bf16.mxu0 %v428_v2  ;;  %v431_v4 = vld [vmem:[#allocation5 + $0x14] ss:$8 sps:$4 sm:$0xff]   ;;  %v433_v5 = vld [vmem:[#allocation5 + $0x10] ss:$8 sps:$4 sm:$0xff]  }
  0x3a   :  { %131 = vmatpush1.bf16.msra.mxu0 %v430_v3  ;;  %v434_v6 = vld [vmem:[#allocation5 + $0x24] ss:$8 sps:$4 sm:$0x1f]   ;;  %v436_v7 = vld [vmem:[#allocation5 + $0x20] ss:$8 sps:$4 sm:$0x1f]  }
  0x3b   :  { %132 = vmatprep.subr.bf16.mxu0 %v431_v4  ;;  %v70_v8 = vld [vmem:[#allocation3] sm:$0xff]  ;;  %v440_v11 = vld [vmem:[#allocation7 + $0x14] ss:$8 sps:$4 sm:$0xff]   ;;  %v71_v12 = vld [vmem:[#allocation3 + $0x8] sm:$0xff]  ;;  %v125_v13 = vsel %vm123_vm0, %v436_v7, 0  ;;  %vm119_vm1 = vcmask 343040  }
  0x3c   :  { %v437_v9 = vld [vmem:[#allocation7 + $0x4] ss:$8 sps:$4 sm:$0xff]   ;;  %v439_v10 = vld [vmem:[#allocation7] ss:$8 sps:$4 sm:$0xff]   ;;  %v442_v14 = vld [vmem:[#allocation7 + $0x10] ss:$8 sps:$4 sm:$0xff]   ;;  %v72_v16 = vpack.c.bf16 %v71_v12, %v70_v8 }
  0x3d   :  { %303 = vmatprep.subr.bf16.mxu1 %v437_v9  ;;  %v443_v15 = vld [vmem:[#allocation7 + $0x24] ss:$8 sps:$4 sm:$0xff]   ;;  %v445_v17 = vld [vmem:[#allocation7 + $0x20] ss:$8 sps:$4 sm:$0xff]   ;;  %v446_v18 = vld [vmem:[#allocation7 + $0x34] ss:$8 sps:$4 sm:$0xff]  }
  0x3e   :  { %133 = vmatpush1.bf16.msra.mxu0 %v433_v5  ;;  %304 = vmatpush1.bf16.msra.mxu1 %v439_v10  ;;  %v448_v19 = vld [vmem:[#allocation7 + $0x30] ss:$8 sps:$4 sm:$0xff]   ;;  %v449_v20 = vld [vmem:[#allocation7 + $0x44] ss:$8 sps:$4 sm:$0xff]   ;;  %v451_v21 = vld [vmem:[#allocation7 + $0x40] ss:$8 sps:$4 sm:$0xff]  }
  0x3f   :  { %400 = vmatprep.subr.msk.bf16.mxu0 %vm123_vm0, %v434_v6  ;;  %305 = vmatprep.subr.bf16.mxu1 %v440_v11  ;;  %v452_v22 = vld [vmem:[#allocation7 + $0x54] ss:$8 sps:$4 sm:$0xff]   ;;  %v454_v23 = vld [vmem:[#allocation7 + $0x50] ss:$8 sps:$4 sm:$0xff]   ;;  %v455_v24 = vld [vmem:[#allocation7 + $0x64] ss:$8 sps:$4 sm:$0xff]  }
  0x40   :  { %v457_v25 = vld [vmem:[#allocation7 + $0x60] ss:$8 sps:$4 sm:$0xff]   ;;  %v458_v26 = vld [vmem:[#allocation7 + $0x74] ss:$8 sps:$4 sm:$0xff]   ;;  %v460_v27 = vld [vmem:[#allocation7 + $0x70] ss:$8 sps:$4 sm:$0xff]  }
  0x41   :  { %v461_v28 = vld [vmem:[#allocation7 + $0x84] ss:$8 sps:$4 sm:$0xff]   ;;  %v463_v29 = vld [vmem:[#allocation7 + $0x80] ss:$8 sps:$4 sm:$0xff]   ;;  %v82_v31 = vshrl.u32 %v81_v30, 7  ;;  %vm299_vm2 = vcmask 130048  }
  0x42   :  { %135 = vmatpush1.bf16.msra.mxu0 %v125_v13  ;;  %306 = vmatpush1.bf16.msra.mxu1 %v442_v14  ;;  %v79_v33 = vld [vmem:[%s659_s2] sm:$0x3]  ;;  %vm385_vm3 = vcmask 7168  }
  0x43   :  { %307 = vmatprep.subr.bf16.mxu1 %v443_v15  ;;  %v83_v32 = vsub.s32 0, %v82_v31  ;;  %v87_v34 = vsub.s32 1, %v82_v31  ;;  %v197_v51 = vld [vmem:[%s661_s4] sm:$0x3] }
  0x44   :  { %v350_v54 = vld [vmem:[%s662_s5] sm:$0x3] }
  0x45   :  { %401 = vmatmul.mubr.msk.bf16.vlgmr.msra.gmra.mrb[0].mxu0 %vm119_vm1, %v72_v16  ;;  %v84_v35 = vrot.slane %v79_v33, %v83_v32  ;;  %v88_v36 = vrot.slane %v79_v33, %v87_v34  ;;  %v202_v52 = vrot.slane %v197_v51, %v83_v32  ;;  %v206_v53 = vrot.slane %v197_v51, %v87_v34  ;;  %v421_v13 = vld [vmem:[#allocation2] ss:$0 sm:$0xff] }
  0x46   :  { %308 = vmatpush1.bf16.msra.mxu1 %v445_v17  ;;  %v359_v60 = vrot.slane %v350_v54, %v87_v34  ;;  %v355_v63 = vrot.slane %v350_v54, %v83_v32 }
  0x47   :  { %309 = vmatprep.subr.bf16.mxu1 %v446_v18 }
  0x4a   :  { %310 = vmatpush1.bf16.msra.mxu1 %v448_v19 }
  0x4b   :  { %311 = vmatprep.subr.bf16.mxu1 %v449_v20 }
  0x4e   :  { %312 = vmatpush1.bf16.msra.mxu1 %v451_v21 }
  0x4f   :  { %313 = vmatprep.subr.bf16.mxu1 %v452_v22 }
  0x52   :  { %314 = vmatpush1.bf16.msra.mxu1 %v454_v23 }
  0x53   :  { %315 = vmatprep.subr.bf16.mxu1 %v455_v24 }
  0x56   :  { %316 = vmatpush1.bf16.msra.mxu1 %v457_v25 }
  0x57   :  { %317 = vmatprep.subr.bf16.mxu1 %v458_v26 }
  0x5a   :  { %318 = vmatpush1.bf16.msra.mxu1 %v460_v27 }
  0x5b   :  { %319 = vmatprep.subr.bf16.mxu1 %v461_v28 }
  0x5e   :  { %320 = vmatpush1.bf16.msra.mxu1 %v463_v29 }
 0x118   :  { %v164_v37 = vpop.f32.mrb[0].mxu0 }
 0x119   :  { %v165_v38 = vadd.f32 %v164_v37, %v84_v35  ;;  %v166_v39 = vpop.f32.mrb[1].mxu0 }
 0x11a   :  { %v167_v40 = vadd.f32 %v166_v39, %v88_v36  ;;  %v168_v41 = vpop.f32.mrb[2].mxu0 }
 0x11b   :  { %v169_v42 = vadd.f32 %v168_v41, %v84_v35  ;;  %v170_v43 = vpop.f32.mrb[3].mxu0  ;;  %v173_v45 = vmax.f32 %v165_v38, 0.0 }
 0x11c   :  { %v171_v44 = vadd.f32 %v170_v43, %v88_v36  ;;  %v174_v47 = vmax.f32 %v167_v40, 0.0 }
 0x11d   :  { %v175_v46 = vmax.f32 %v169_v42, 0.0 }
 0x11e   :  { %v176_v48 = vmax.f32 %v171_v44, 0.0 }
 0x11f   :  { %v177_v49 = vpack.c.bf16 %v175_v46, %v173_v45 }
 0x120   :  { %v178_v50 = vpack.c.bf16 %v176_v48, %v174_v47 }
 0x122   :  { %420 = vmatprep.mubr.msk.bf16.mxu1 %vm299_vm2, %v178_v50 }
 0x123   :  { %336 = vmatmul.mubr.bf16.vlgmr.msra.gmra.mrb[0].mxu1 %v177_v49 }
 0x1f6   :  { %v337_v55 = vpop.f32.mrb[0].mxu1 }
 0x1f7   :  { %v338_v56 = vadd.f32 %v337_v55, %v202_v52  ;;  %v339_v57 = vpop.f32.mrb[1].mxu1 }
 0x1f8   :  { %v340_v58 = vadd.f32 %v339_v57, %v206_v53  ;;  %v341_v59 = vpop.f32.mrb[2].mxu1 }
 0x1f9   :  { %v346_v61 = vmax.f32 %v338_v56, 0.0  ;;  %v342_v62 = vadd.f32 %v341_v59, %v202_v52  ;;  %v343_v0 = vpop.f32.mrb[3].mxu1 }
 0x1fa   :  { %v347_v1 = vmax.f32 %v340_v58, 0.0  ;;  %v344_v2 = vadd.f32 %v343_v0, %v206_v53 }
 0x1fb   :  { %v348_v3 = vmax.f32 %v342_v62, 0.0  ;;  %v362_v6 = vmul.f32 %v355_v63, %v346_v61 }
 0x1fc   :  { %v349_v4 = vmax.f32 %v344_v2, 0.0  ;;  %v363_v5 = vmul.f32 %v359_v60, %v347_v1 }
 0x1fd   :  { %v364_v9 = vmul.f32 %v355_v63, %v348_v3 }
 0x1fe   :  { %v365_v7 = vmul.f32 %v359_v60, %v349_v4  ;;  %v366_v8 = vsel %vm299_vm2, %v363_v5, 0.0 }
 0x1ff   :  { %v367_v10 = vadd.f32 %v366_v8, %v362_v6 }
 0x200   :  { %v370_v11 = vsel %vm299_vm2, %v365_v7, 0.0 }
 0x201   :  { %368 = vadd.xlane.f32.xlu0 %v367_v10  ;;  %v371_v12 = vadd.f32 %v370_v11, %v364_v9 }
 0x205   :  { %372 = vadd.xlane.f32.xlu0 %v371_v12 }
 0x28e   :  { %v369_v14 = vpop.xlane.xlu0 %368 }
 0x28f   :  { %v381_v15 = vadd.f32 %v421_v13, %v369_v14 }
 0x291   :  { %464 = vtanh.f32 %v381_v15 }
 0x292   :  { %v373_v16 = vpop.xlane.xlu0 %372 }
 0x293   :  { %v382_v17 = vadd.f32 %v421_v13, %v373_v16 }
 0x295   :  { %466 = vtanh.f32 %v382_v17 }
 0x29b   :  { %v465_v18 = vpop.eup %464 }
 0x29c   :  { %386 = vst.msk [vmem:[%s664_s7] sm:$0xff] %vm385_vm3, %v465_v18 }
 0x29f   :  { %v467_v19 = vpop.eup %466 }
 0x2a0   :  { %387 = vst.msk [vmem:[%s664_s7 + $0x8] sm:$0xff] %vm385_vm3, %v467_v19 }
 0x2a1   :  { %392 = vsyncpa [#allocation4], 1 }
 0x2a2   :  { %393 = vsyncpa [#allocation6], 1 }

</bundles_post_ra>
